<compile_context>
chip_gen: v5e
topology: v5e:2x2
jax: 0.10.0
libtpu: 0.0.40
codegen_flags: <defaults>
</compile_context>

<pallas_src>
import functools
import math

import jax
import jax.numpy as jnp
from jax.experimental import pallas as pl
from jax.experimental.pallas import tpu as pltpu


def _round_up(v, m):
    return (v + m - 1) // m * m


def _mlp_fused_kernel(*refs, layer_cfgs, last_out_dim):
    """Fused (Linear -> [BN] -> [ReLU]) chain in one kernel invocation.

    refs = (x_ref, w0, [b0], w1, [b1], ..., o_ref)
      x_ref : (N, in_dim)        f32, unpadded (full-array VMEM block)
      w_i   : (K_i, out_pad_i)   bf16, pre-transposed (no w.T in kernel),
                                 out dim zero-padded to a 128 multiple
      b_i   : (1, out_pad_i)     f32, only present if the layer has a bias
      o_ref : (N, out_dim_last)  f32, unpadded
    Intermediates never leave VMEM/vregs; matmuls run in bf16 on the MXU with
    f32 accumulation, bias/BN/ReLU math stays in f32.
    """
    x_ref = refs[0]
    o_ref = refs[-1]
    params = refs[1:-1]

    y = x_ref[...].astype(jnp.float32)
    p = 0
    for cfg in layer_cfgs:
        w = params[p][...]          # bf16 (K, out_pad)
        p += 1
        # Native-dtype MXU matmul, f32 accumulation.
        y = jnp.dot(y.astype(jnp.bfloat16), w,
                    preferred_element_type=jnp.float32)
        if cfg["use_bias"]:
            y = y + params[p][...]
            p += 1
        if cfg["use_bn"]:
            # Training-mode BatchNorm1d (gamma=1, beta=0, eps=1e-5) over the
            # true batch rows.  The batch is NOT padded, so no masking is
            # needed; two-pass variance matches the PyTorch formulation.
            mean = jnp.mean(y, axis=0, keepdims=True)
            diff = y - mean
            var = jnp.mean(diff * diff, axis=0, keepdims=True)
            y = diff * jax.lax.rsqrt(var + 1e-5)   # rsqrt -> EUP
        if cfg["use_relu"]:
            y = jnp.maximum(y, 0.0)
    # Drop the lane padding of the last layer on the way out (one small masked
    # store; avoids a separate host-side slice kernel).
    o_ref[...] = y[:, :last_out_dim].astype(o_ref.dtype)


def mlp_forward_fused(x, weights, biases, layer_cfgs, last_out_dim):
    """Run the whole MLP as one grid-less pallas_call (everything resident)."""
    n, in_dim = x.shape
    assert n >= 1, "MLP forward requires a non-empty batch."
    assert in_dim == weights[0].shape[0], (in_dim, weights[0].shape)

    operands = [x.astype(jnp.float32)]
    flops = 0
    transcendentals = 0
    bytes_accessed = x.size * 4
    resident_bytes = x.size * 4
    for cfg, w, b in zip(layer_cfgs, weights, biases):
        operands.append(w)
        flops += 2 * n * w.shape[0] * w.shape[1]
        bytes_accessed += w.size * 2          # bf16 weights
        resident_bytes += w.size * 2
        if cfg["use_bias"]:
            operands.append(b)
            bytes_accessed += b.size * 4
            resident_bytes += b.size * 4
        if cfg["use_bn"]:
            transcendentals += w.shape[1]     # rsqrt per (padded) feature
        resident_bytes += n * w.shape[1] * 4  # f32 intermediate activation
    bytes_accessed += n * last_out_dim * 4
    resident_bytes += n * last_out_dim * 4

    # Explicit VMEM budget: everything is resident in one fused block.  Keep a
    # generous multiplier for compiler temporaries, floor well above need,
    # cap below any generation's physical VMEM (v7x has only 64 MiB).
    vmem_limit = int(min(60 * 2**20, max(16 * 2**20, 6 * resident_bytes)))

    kern = functools.partial(
        _mlp_fused_kernel,
        layer_cfgs=tuple(layer_cfgs),
        last_out_dim=last_out_dim,
    )
    return pl.pallas_call(
        kern,
        out_shape=jax.ShapeDtypeStruct((n, last_out_dim), jnp.float32),
        compiler_params=pltpu.CompilerParams(vmem_limit_bytes=vmem_limit),
        cost_estimate=pl.CostEstimate(
            flops=flops,
            transcendentals=transcendentals,
            bytes_accessed=bytes_accessed,
        ),
    )(*operands)


class MLPPallas:
    """JAX/Pallas re-implementation of the PyTorch MLP head (fused forward)."""

    def __init__(self, layers, key):
        self.layer_cfgs = []
        self.weights = []     # pre-transposed, lane-padded, bf16
        self.biases = []      # (1, out_pad) f32
        self.raw_params = []  # unpadded f32 (w, b) for reference checks
        prev_out_pad = None
        for li, layer in enumerate(layers):
            key, wk, bk = jax.random.split(key, 3)
            in_dim, out_dim = layer["in_dim"], layer["out_dim"]
            use_bias = bool(layer.get("bias", True))
            # nn.init.kaiming_normal_(weight, nonlinearity='relu'):
            #   std = sqrt(2 / fan_in), fan_in = in_dim for Linear weights.
            std = math.sqrt(2.0 / in_dim)
            w = std * jax.random.normal(wk, (out_dim, in_dim), jnp.float32)
            if use_bias:
                # default nn.Linear bias init: U(-1/sqrt(fan_in), 1/sqrt(fan_in))
                bound = 1.0 / math.sqrt(in_dim)
                b = jax.random.uniform(
                    bk, (out_dim,), jnp.float32, minval=-bound, maxval=bound
                )
            else:
                b = jnp.zeros((out_dim,), jnp.float32)

            out_pad = _round_up(out_dim, 128)
            # Contraction dim: the raw in_dim for the first layer (x is passed
            # unpadded), and the previous layer's padded width afterwards so
            # the intermediate activation can flow through without reshaping.
            k_dim = in_dim if li == 0 else prev_out_pad
            assert li == 0 or in_dim <= prev_out_pad
            # Pre-transpose once (PyTorch (out,in) -> (in,out)), zero-pad to
            # lane-dense 128 multiples, store as bf16 (native MXU dtype).
            # Zero padding is provably inert end-to-end.
            w_t = (
                jnp.zeros((k_dim, out_pad), jnp.float32)
                .at[:in_dim, :out_dim]
                .set(w.T)
                .astype(jnp.bfloat16)
            )
            b_p = jnp.zeros((1, out_pad), jnp.float32).at[0, :out_dim].set(b)

            self.weights.append(w_t)
            self.biases.append(b_p)
            self.raw_params.append((w, b))
            self.layer_cfgs.append(
                dict(
                    use_bias=use_bias,
                    use_bn=bool(layer.get("batch_norm", False)),
                    use_relu=bool(layer.get("relu", False)),
                )
            )
            prev_out_pad = out_pad
        self.last_out_dim = layers[-1]["out_dim"]

    def __call__(self, batch):
        if isinstance(batch, list):
            assert len(batch) == 1, (
                "MLP input should be either a tensor (2D, 4D) or list containing 1 tensor."
            )
            batch = batch[0]
        if batch.ndim > 2:
            assert all(d == 1 for d in batch.shape[2:]), (
                f"MLP expected 2D input tensor or 4D tensor of shape NxCx1x1. got: {batch.shape}"
            )
            batch = batch.reshape((batch.shape[0], batch.shape[1]))
        return mlp_forward_fused(
            batch, self.weights, self.biases, self.layer_cfgs, self.last_out_dim
        )


def _mlp_reference(x, model):
    """Pure-JAX f32 reference matching the PyTorch forward (training-mode BN)."""
    y = x.astype(jnp.float32)
    for (w, b), cfg in zip(model.raw_params, model.layer_cfgs):
        y = y @ w.T
        if cfg["use_bias"]:
            y = y + b[None, :]
        if cfg["use_bn"]:
            mean = jnp.mean(y, axis=0, keepdims=True)
            var = jnp.mean((y - mean) ** 2, axis=0, keepdims=True)
            y = (y - mean) * jax.lax.rsqrt(var + 1e-5)
        if cfg["use_relu"]:
            y = jnp.maximum(y, 0.0)
    return y


if __name__ == "__main__":
    key = jax.random.PRNGKey(0)
    key, pkey, xkey = jax.random.split(key, 3)

    # Config analogous to the ListConfig the PyTorch module consumes.
    layers_cfg = [
        {"in_dim": 32, "out_dim": 64, "bias": True, "batch_norm": True, "relu": True},
        {"in_dim": 64, "out_dim": 16, "bias": True},
    ]
    model = MLPPallas(layers_cfg, pkey)

    # NxCx1x1 input, as accepted by the PyTorch forward (N=4, C=32).
    x = jax.random.normal(xkey, (4, 32, 1, 1), jnp.float32)

    out = model([x])  # list-of-one-tensor input path, like the PyTorch forward
    out = jax.block_until_ready(out)
    assert out.shape == (4, 16), out.shape

    # Compare against the pure-f32 reference.  The kernel runs its matmuls in
    # bf16 (f32 accumulation), which introduces ~1e-3-level relative deviation
    # at these layer widths; 3e-2 absolute comfortably covers that while still
    # catching any structural error.
    ref = _mlp_reference(x.reshape(4, 32), model)
    err = float(jnp.max(jnp.abs(out - ref)))
    assert err < 3e-2, f"max abs error vs reference: {err}"

    print("KERNEL_OK")
</pallas_src>

<mosaic_0001>
module attributes {stable_mosaic.version = 11 : i64} {
  func.func @_mlp_fused_kernel(%arg0: memref<4x32xf32, #tpu.memory_space<vmem>>, %arg1: memref<32x128xbf16, #tpu.memory_space<vmem>>, %arg2: memref<1x128xf32, #tpu.memory_space<vmem>>, %arg3: memref<128x128xbf16, #tpu.memory_space<vmem>>, %arg4: memref<1x128xf32, #tpu.memory_space<vmem>>, %arg5: memref<4x16xf32, #tpu.memory_space<vmem>>) attributes {dimension_semantics = [], scalar_prefetch = 0 : i64, scratch_operands = 0 : i64, tpu.core_type = #tpu.core_type<tc>} {
    %c0 = arith.constant 0 : index
    %c0_0 = arith.constant 0 : index
    %0 = vector.load %arg0[%c0, %c0_0] : memref<4x32xf32, #tpu.memory_space<vmem>>, vector<4x32xf32>
    %c0_1 = arith.constant 0 : index
    %c0_2 = arith.constant 0 : index
    %1 = vector.load %arg1[%c0_1, %c0_2] : memref<32x128xbf16, #tpu.memory_space<vmem>>, vector<32x128xbf16>
    %2 = arith.truncf %0 : vector<4x32xf32> to vector<4x32xbf16>
    %cst = arith.constant dense<0.000000e+00> : vector<4x128xf32>
    %3 = tpu.matmul %2, %1, %cst {dimension_numbers = #tpu.dot_dimension_numbers<[1], [0], [0], [1], [0, 0, 1, 1], [], []>} : vector<4x32xbf16>, vector<32x128xbf16>, vector<4x128xf32> -> vector<4x128xf32>
    %c0_3 = arith.constant 0 : index
    %c0_4 = arith.constant 0 : index
    %4 = vector.load %arg2[%c0_3, %c0_4] : memref<1x128xf32, #tpu.memory_space<vmem>>, vector<1x128xf32>
    %5 = vector.broadcast %4 : vector<1x128xf32> to vector<4x128xf32>
    %6 = arith.addf %3, %5 : vector<4x128xf32>
    %cst_5 = arith.constant dense<0.000000e+00> : vector<128xf32>
    %7 = vector.multi_reduction <add>, %6, %cst_5 [0] : vector<4x128xf32> to vector<128xf32>
    %8 = vector.shape_cast %7 : vector<128xf32> to vector<1x128xf32>
    %cst_6 = arith.constant 4.000000e+00 : f32
    %9 = vector.broadcast %cst_6 : f32 to vector<1x128xf32>
    %10 = arith.divf %8, %9 : vector<1x128xf32>
    %11 = vector.broadcast %10 : vector<1x128xf32> to vector<4x128xf32>
    %12 = arith.subf %6, %11 : vector<4x128xf32>
    %13 = arith.mulf %12, %12 : vector<4x128xf32>
    %cst_7 = arith.constant dense<0.000000e+00> : vector<128xf32>
    %14 = vector.multi_reduction <add>, %13, %cst_7 [0] : vector<4x128xf32> to vector<128xf32>
    %15 = vector.shape_cast %14 : vector<128xf32> to vector<1x128xf32>
    %cst_8 = arith.constant 4.000000e+00 : f32
    %16 = vector.broadcast %cst_8 : f32 to vector<1x128xf32>
    %17 = arith.divf %15, %16 : vector<1x128xf32>
    %cst_9 = arith.constant 9.99999974E-6 : f32
    %18 = vector.broadcast %cst_9 : f32 to vector<1x128xf32>
    %19 = arith.addf %17, %18 : vector<1x128xf32>
    %20 = math.rsqrt %19 : vector<1x128xf32>
    %21 = vector.broadcast %20 : vector<1x128xf32> to vector<4x128xf32>
    %22 = arith.mulf %12, %21 : vector<4x128xf32>
    %cst_10 = arith.constant 0.000000e+00 : f32
    %23 = vector.broadcast %cst_10 : f32 to vector<4x128xf32>
    %24 = arith.maximumf %22, %23 : vector<4x128xf32>
    %c0_11 = arith.constant 0 : index
    %c0_12 = arith.constant 0 : index
    %25 = vector.load %arg3[%c0_11, %c0_12] : memref<128x128xbf16, #tpu.memory_space<vmem>>, vector<128x128xbf16>
    %26 = arith.truncf %24 : vector<4x128xf32> to vector<4x128xbf16>
    %cst_13 = arith.constant dense<0.000000e+00> : vector<4x128xf32>
    %27 = tpu.matmul %26, %25, %cst_13 {dimension_numbers = #tpu.dot_dimension_numbers<[1], [0], [0], [1], [0, 0, 1, 1], [], []>} : vector<4x128xbf16>, vector<128x128xbf16>, vector<4x128xf32> -> vector<4x128xf32>
    %c0_14 = arith.constant 0 : index
    %c0_15 = arith.constant 0 : index
    %28 = vector.load %arg4[%c0_14, %c0_15] : memref<1x128xf32, #tpu.memory_space<vmem>>, vector<1x128xf32>
    %29 = vector.broadcast %28 : vector<1x128xf32> to vector<4x128xf32>
    %30 = arith.addf %27, %29 : vector<4x128xf32>
    %31 = vector.extract_strided_slice %30 {offsets = [0, 0], sizes = [4, 16], strides = [1, 1]} : vector<4x128xf32> to vector<4x16xf32>
    %c0_16 = arith.constant 0 : index
    %c0_17 = arith.constant 0 : index
    %32 = vector.load %arg5[%c0_16, %c0_17] : memref<4x16xf32, #tpu.memory_space<vmem>>, vector<4x16xf32>
    tpu.vector_store %arg5[%c0_16, %c0_17], %31 {strides = array<i32>} : memref<4x16xf32, #tpu.memory_space<vmem>>, vector<4x16xf32>,
    return
  }
}

</mosaic_0001>

<bundles_post_ra>
// kernel: tpu_custom_call.1
= control target key start
LH: loop header
LB: loop body
LE: loop exit
PB: predicated region body
PF: predicated region fallthrough
CT: control target
= control target key end

     0   :  { %10 = vsyncpa [#allocation3], 0  ;;  %s470_s0 = inlined_call_operand.hbm [shape: f32[4,32], index: 0, kind: input, shape index: {}]   ;;  %s471_s1 = inlined_call_operand.hbm [shape: bf16[32,128], index: 1, kind: input, shape index: {}]   ;;  %s472_s2 = inlined_call_operand.vmem [shape: f32[1,128], index: 2, kind: input, shape index: {}]   ;;  %s473_s3 = inlined_call_operand.hbm [shape: bf16[128,128], index: 3, kind: input, shape index: {}]   ;;  %s474_s4 = inlined_call_operand.vmem [shape: f32[1,128], index: 4, kind: input, shape index: {}]   ;;  %s475_s5 = inlined_call_operand.hbm [shape: f32[4,16], index: 5, kind: output, shape index: {}]  }
   0x1   :  { %11 = vsyncpa [#allocation6], 0  ;;  %s28_s20 = sshll.u32 %s471_s1, 4  ;;  %s29_s20 = int_to_ptr.hbm [resolvable:$true] %s28_s20 }
   0x2   :  { %12 = vsyncpa [#allocation4], 0  ;;  %s413_s21 = smov [#allocation5]   ;;  %s18_s25 = sshll.u32 %s470_s0, 4  ;;  %s19_s25 = int_to_ptr.hbm [resolvable:$true] %s18_s25 }
   0x3   :  { %s30_s22 = sshll.u32 %s413_s21, 4  ;;  %s414_s26 = smov 64   ;;  %s31_s22 = int_to_ptr.vmem [resolvable:$true] %s30_s22 }
   0x4   :  { %s415_s27 = smov 4   ;;  %s416_s28 = smov [#allocation2]  }
   0x5   :  { %36 = dma.hbm_to_vmem [thread:$0]  %s29_s20, 256, %s31_s22, [#allocation6], %s414_s26, %s414_s26, %s415_s27  }
   0x6   :  { %s20_s29 = sshll.u32 %s416_s28, 4  ;;  %s43_s7 = sshll.u32 %s473_s3, 4  ;;  %s21_s29 = int_to_ptr.vmem [resolvable:$true] %s20_s29  ;;  %s44_s7 = int_to_ptr.hbm [resolvable:$true] %s43_s7 }
   0x7   :  { %23 = dma.hbm_to_vmem [thread:$0]  %s19_s25, 64, %s21_s29, [#allocation3]  }
   0x8   :  { %s417_s1 = smov [#allocation7]  }
   0x9   :  { %s45_s8 = sshll.u32 %s417_s1, 4  ;;  %s46_s8 = int_to_ptr.vmem [resolvable:$true] %s45_s8 }
   0xa   :  { %51 = dma.hbm_to_vmem [thread:$0]  %s44_s7, 1024, %s46_s8, [#allocation6], %s414_s26, %s414_s26, %s415_s27  }
   0xb   :  { %407 = dma.done.wait [#allocation3], 64  }
   0xc   :  { %408 = vsyncadd [#allocation3], 4294967232 }
   0xd   :  { %409 = dma.done.wait [#allocation6], 1280  }
   0xe   :  { %410 = vsyncadd [#allocation6], 4294966016  ;;  %v289_v0 = vld [vmem:[#allocation5 + $0x8] sm:$0xff]  ;;  %v288_v1 = vld [vmem:[#allocation5] sm:$0xff]  ;;  %vm89_vm0 = vcmask 261120   ;;  %v418_v4 = vmov 4.0  }
   0xf   :  { %99 = vmatpush.bf16.msra.mxu0 %v289_v0  ;;  %v67_v2 = vld [vmem:[#allocation2] sm:$0xf]  ;;  %307 = vrcp.f32 %v418_v4  ;;  %v297_v8 = vld [vmem:[#allocation7 + $0x38] sm:$0xff]  ;;  %vm106_vm1 = vcmask 1043456   ;;  %v296_v12 = vld [vmem:[#allocation7 + $0x30] sm:$0xff]  ;;  %s419_s10 = smov [#allocation8]  }
  0x10   :  { %v72_v3 = vpack.c.bf16 %v67_v2, %v67_v2  ;;  %v305_v6 = vld [vmem:[%s472_s2] ss:$0 sm:$0xff]  ;;  %214 = vmatpush.bf16.msra.mxu1 %v297_v8  ;;  %v294_v22 = vld [vmem:[#allocation7 + $0x20] sm:$0xff]  ;;  %v293_v26 = vld [vmem:[#allocation7 + $0x18] sm:$0xff]  ;;  %s234_s11 = sshll.u32 %s419_s10, 4  ;;  %s236_s14 = sshll.u32 %s475_s5, 4  ;;  %s235_s11 = int_to_ptr.vmem [resolvable:$true] %s234_s11  ;;  %s237_s14 = int_to_ptr.hbm [resolvable:$true] %s236_s14 }
  0x11   :  { %v295_v17 = vld [vmem:[#allocation7 + $0x28] sm:$0xff]  ;;  %v292_v28 = vld [vmem:[#allocation7 + $0x10] sm:$0xff]  ;;  %v290_v34 = vld [vmem:[#allocation7] sm:$0xff]  ;;  %vm227_vm6 = vcmask 125952  }
  0x12   :  { %v291_v31 = vld [vmem:[#allocation7 + $0x8] sm:$0xff] }
  0x13   :  { %100 = vmatpush.bf16.msra.mxu0 %v288_v1  ;;  %v306_v52 = vld [vmem:[%s474_s4] ss:$0 sm:$0xff] }
  0x14   :  { %215 = vmatpush.bf16.msra.mxu1 %v296_v12 }
  0x15   :  { %v308_v5 = vpop.eup %307 }
  0x16   :  { %255 = vmatmul.msk.bf16.vlgmr.msra.gmra.mxu0 %vm89_vm0, %v72_v3  ;;  %v115_v7 = vmul.f32 4.0, %v308_v5  ;;  %vm119_vm2 = vweird.f32 %v308_v5 }
  0x18   :  { %v116_v11 = vsub.f32 1.0, %v115_v7  ;;  %216 = vmatpush.bf16.msra.mxu1 %v295_v17 }
  0x1a   :  { %v117_v15 = vmul.f32 %v308_v5, %v116_v11 }
  0x1c   :  { %v118_v20 = vadd.f32 %v308_v5, %v117_v15  ;;  %217 = vmatpush.bf16.msra.mxu1 %v294_v22 }
  0x1e   :  { %v120_v24 = vsel %vm119_vm2, %v308_v5, %v118_v20 }
  0x20   :  { %218 = vmatpush.bf16.msra.mxu1 %v293_v26 }
  0x24   :  { %219 = vmatpush.bf16.msra.mxu1 %v292_v28 }
  0x28   :  { %220 = vmatpush.bf16.msra.mxu1 %v291_v31 }
  0x2c   :  { %221 = vmatpush.bf16.msra.mxu1 %v290_v34 }
  0x93   :  { %v102_v9 = vpop.f32.mrf.mxu0 }
  0x94   :  { %v103_v10 = vadd.f32 %v305_v6, %v102_v9 }
  0x96   :  { %v107_v13 = vsel %vm106_vm1, %v103_v10, 0.0 }
  0x97   :  { %v108_v14 = vrot.slane %v107_v13, 4 }
  0x99   :  { %v109_v16 = vadd.f32 %v108_v14, %v107_v13 }
  0x9b   :  { %v110_v18 = vrot.slane %v109_v16, 2  ;;  %v104_v19 = vpop.f32.mrf.mxu0 }
  0x9d   :  { %v111_v21 = vadd.f32 %v110_v18, %v109_v16 }
  0x9f   :  { %v112_v23 = vrot.slane %v111_v21, 1 }
  0xa1   :  { %v113_v25 = vadd.f32 %v112_v23, %v111_v21 }
  0xa3   :  { %v121_v27 = vmul.f32 %v120_v24, %v113_v25 }
  0xa5   :  { %v122_v29 = vsub.f32 %v103_v10, %v121_v27 }
  0xa7   :  { %v123_v30 = vmul.f32 %v122_v29, %v122_v29 }
  0xa9   :  { %v124_v32 = vsel %vm106_vm1, %v123_v30, 0.0 }
  0xaa   :  { %v125_v33 = vrot.slane %v124_v32, 4 }
  0xac   :  { %v126_v35 = vadd.f32 %v125_v33, %v124_v32 }
  0xae   :  { %v127_v36 = vrot.slane %v126_v35, 2 }
  0xb0   :  { %v128_v37 = vadd.f32 %v127_v36, %v126_v35 }
  0xb2   :  { %v129_v38 = vrot.slane %v128_v37, 1 }
  0xb4   :  { %v130_v39 = vadd.f32 %v129_v38, %v128_v37 }
  0xb6   :  { %v131_v40 = vmul.f32 %v130_v39, %v120_v24 }
  0xb8   :  { %v132_v41 = vadd.f32 1e-05, %v131_v40 }
  0xba   :  { %309 = vrsqrt.f32 %v132_v41  ;;  %vm139_vm4 = vweird.f32 %v132_v41 }
  0xc0   :  { %v310_v42 = vpop.eup %309 }
  0xc1   :  { %v134_v43 = vmul.f32 %v310_v42, %v132_v41  ;;  %vm140_vm3 = vweird.f32 %v310_v42 }
  0xc2   :  { %vm141_vm5 = vmor %vm139_vm4, %vm140_vm3 }
  0xc3   :  { %v135_v44 = vmul.f32 %v310_v42, %v134_v43 }
  0xc5   :  { %v136_v45 = vmul.f32 0.5, %v135_v44 }
  0xc7   :  { %v137_v46 = vsub.f32 1.5, %v136_v45 }
  0xc9   :  { %v138_v47 = vmul.f32 %v310_v42, %v137_v46 }
  0xcb   :  { %v142_v48 = vsel %vm141_vm5, %v310_v42, %v138_v47 }
  0xcc   :  { %v143_v49 = vmul.f32 %v142_v48, %v122_v29 }
  0xce   :  { %v144_v50 = vmax.f32 %v143_v49, 0.0 }
  0xd0   :  { %v161_v51 = vpack.c.bf16 %v144_v50, %v144_v50 }
  0xd2   :  { %222 = vmatmul.bf16.vlgmr.msra.gmra.mxu1 %v161_v51 }
 0x14f   :  { %v223_v53 = vpop.f32.mrf.mxu1 }
 0x150   :  { %v224_v54 = vadd.f32 %v306_v52, %v223_v53 }
 0x152   :  { %228 = vst.msk [vmem:[#allocation8] sm:$0xf] %vm227_vm6, %v224_v54 }
 0x153   :  { %239 = dma.vmem_to_hbm [thread:$0]  %s235_s11, 64, %s237_s14, [#allocation4]  }
 0x157   :  { %v225_v55 = vpop.f32.mrf.mxu1 }
 0x158   :  { %411 = dma.done.wait [#allocation4], 64  }
 0x159   :  { %412 = vsyncadd [#allocation4], 4294967232 }
 0x15a   :  { %244 = vsyncpa [#allocation3], 1 }
 0x15b   :  { %245 = vsyncpa [#allocation6], 1 }
 0x15c   :  { %246 = vsyncpa [#allocation4], 1 }

</bundles_post_ra>
